<compile_context>
chip_gen: v5e
topology: v5e:2x2
jax: 0.10.0
libtpu: 0.0.40
codegen_flags: <defaults>
</compile_context>

<pallas_src>
import math

import jax
import jax.numpy as jnp
from jax.experimental import pallas as pl
from jax.experimental.pallas import tpu as pltpu


def _copy_kernel(x_ref, o_ref):
    # Identity copy of the current (tile_rows, width) tile.
    o_ref[...] = x_ref[...]


def _align_up(n, m):
    return ((n + m - 1) // m) * m


def _vmem_cap_bytes():
    """Scoped-VMEM ceiling: 3/4 of physical per-core VMEM (leaves headroom
    for Mosaic internal scratch).  v7x: ~48 MiB, v5e/v6e: ~96 MiB."""
    phys = 64 << 20  # conservative fallback (v7x per-TensorCore VMEM)
    try:
        info = pltpu.get_tpu_info()
        phys = int(getattr(info, "vmem_capacity_bytes", phys))
    except Exception:
        pass
    return max(16 << 20, (phys * 3) // 4)


def _choose_tiling(total, dtype_bytes, tile_bytes):
    """Pick a lane-dense (rows, width) slab layout and a row-tile size.

    Returns (width, rows, tile_rows).  `rows` need NOT be divisible by
    `tile_rows`: the caller uses a cdiv grid and Pallas masks the partial
    last block, so there is no full-slab fallback anymore.
    """
    width = None
    for cand in (4096, 2048, 1024, 512, 384, 256, 128):
        if total % cand == 0:
            width = cand
            break
    if width is None:
        # total has no multiple-of-128 factor (odd element count).  Use the
        # largest divisor <= 4096 as the last dim: the block's last dim then
        # equals the full array dim (legal), the layout is merely lane-padded.
        # Correct and VMEM-safe; lower bandwidth, but this case is rare.
        width, d = 1, 1
        while d * d <= total:
            if total % d == 0:
                q = total // d
                if d <= 4096:
                    width = max(width, d)
                if q <= 4096:
                    width = max(width, q)
            d += 1
    rows = total // width

    # Sublane alignment: 8 rows for 4-byte dtypes, 16 for 2-byte, 32 for 1-byte.
    sublane = 8 * max(1, 4 // dtype_bytes)
    if rows <= sublane:
        # Single small block; second-to-last dim equals the full array dim.
        return width, rows, rows

    budget_rows = tile_bytes // (width * dtype_bytes)
    tile_rows = max(sublane, (budget_rows // sublane) * sublane)
    if tile_rows >= rows:
        # Force >= 2 grid steps so both v7x TensorCores get balanced work
        # (neutral on single-TC v5e/v6e).
        tile_rows = _align_up((rows + 1) // 2, sublane)
    return width, rows, tile_rows


def pallas_reshape(x, *shape, tile_bytes=8 * 1024 * 1024, copy=False):
    """Equivalent of Reshape(*shape)(x) == x.view(x.shape[0], *shape).

    copy=False (default): metadata-only reshape, zero bytes moved — exactly
    what torch's .view does on a contiguous tensor.
    copy=True: force a physical copy via the tiled Pallas streaming kernel.
    """
    b = x.shape[0]
    f_in = math.prod(x.shape[1:]) if x.ndim > 1 else 1
    f_out = math.prod(shape) if shape else 1
    if f_in != f_out:
        raise ValueError(
            f"cannot reshape batch payload of size {f_in} into {shape}"
        )
    out_shape = (b,) + tuple(shape)

    total = b * f_in
    if total == 0 or not copy:
        # Metadata-only path (the default).
        return jnp.reshape(x, out_shape)

    dtype_bytes = jnp.dtype(x.dtype).itemsize
    vmem_cap = _vmem_cap_bytes()
    # in + out tiles, each double-buffered (4 * block) + headroom must fit the
    # scoped limit on every chip generation.
    tile_bytes = max(64 * 1024, min(int(tile_bytes), (vmem_cap - (4 << 20)) // 4))

    # Row-major flatten (metadata-only) == torch contiguous element order.
    flat = jnp.reshape(x, (total,))
    width, rows, tile_rows = _choose_tiling(total, dtype_bytes, tile_bytes)
    slab = jnp.reshape(flat, (rows, width))

    grid = (pl.cdiv(rows, tile_rows),)
    block_bytes = tile_rows * width * dtype_bytes
    vmem_limit = int(min(max(32 << 20, 4 * block_bytes + (2 << 20)), vmem_cap))

    # NOTE: for sub-MiB caller-supplied tiles, pipeline_mode=pl.Buffered(3)
    # on the input spec can hide exposed DMA latency; left at the default
    # 2-deep buffering since the 8 MiB default tile fully hides it.
    # TODO(synk): an HBM->HBM chunked-DMA variant (memory_space=pl.ANY +
    # pltpu.make_async_copy) would remove VMEM staging entirely; the
    # BlockSpec-pipelined copy is kept for simplicity and robustness.
    out_slab = pl.pallas_call(
        _copy_kernel,
        out_shape=jax.ShapeDtypeStruct((rows, width), x.dtype),
        grid_spec=pltpu.PrefetchScalarGridSpec(
            num_scalar_prefetch=0,
            grid=grid,
            in_specs=[pl.BlockSpec((tile_rows, width), lambda i: (i, 0))],
            out_specs=pl.BlockSpec((tile_rows, width), lambda i: (i, 0)),
        ),
        compiler_params=pltpu.CompilerParams(
            # Identity copy: tile i depends only on tile i, so the streamed
            # axis is safely "parallel" (sharded across v7x's 2 TensorCores).
            dimension_semantics=("parallel",),
            vmem_limit_bytes=vmem_limit,
        ),
        cost_estimate=pl.CostEstimate(
            flops=0,
            transcendentals=0,
            bytes_accessed=2 * total * dtype_bytes,
        ),
    )(slab)

    # Final metadata-only reshape to (B, *shape), matching x.view semantics.
    return jnp.reshape(out_slab, out_shape)


class Reshape:
    """Mirror of the PyTorch module."""

    def __init__(self, *shape):
        self.shape = tuple(shape)

    def __call__(self, x, **kw):
        return pallas_reshape(x, *self.shape, **kw)


if __name__ == "__main__":
    key = jax.random.PRNGKey(0)

    # 1) Module example: NCHW (2, 4, 16, 16) reshaped per-batch to (16, 64);
    #    force the Pallas copy path.
    x1 = jax.random.normal(key, (2, 4, 16, 16), dtype=jnp.float32)
    y1 = Reshape(16, 64)(x1, copy=True)
    jax.block_until_ready(y1)
    ref1 = jnp.reshape(x1, (2, 16, 64))
    assert y1.shape == (2, 16, 64), y1.shape
    assert y1.dtype == x1.dtype
    assert bool(jnp.array_equal(y1, ref1))

    # 2) Multi-tile streaming grid with a partial last block:
    #    (5, 8, 32, 64) -> (32, 512); rows=20, tile_rows=16 -> grid=2 (cdiv).
    x2 = jax.random.normal(jax.random.PRNGKey(0), (5, 8, 32, 64),
                           dtype=jnp.float32)
    y2 = pallas_reshape(x2, 32, 512, tile_bytes=256 * 1024, copy=True)
    jax.block_until_ready(y2)
    assert y2.shape == (5, 32, 512), y2.shape
    assert bool(jnp.array_equal(y2, jnp.reshape(x2, (5, 32, 512))))

    # 3) Odd element count (total=105, no multiple-of-128 factor) still goes
    #    through the tiled kernel instead of a full-slab fallback.
    x3 = jax.random.normal(jax.random.PRNGKey(0), (3, 5, 7), dtype=jnp.float32)
    y3 = pallas_reshape(x3, 35, copy=True)
    jax.block_until_ready(y3)
    assert y3.shape == (3, 35), y3.shape
    assert bool(jnp.array_equal(y3, jnp.reshape(x3, (3, 35))))

    # 4) Default zero-copy (view) path — exact torch .view semantics.
    y4 = Reshape(4, 256)(x1)
    jax.block_until_ready(y4)
    assert y4.shape == (2, 4, 256), y4.shape
    assert bool(jnp.array_equal(y4, jnp.reshape(x1, (2, 4, 256))))

    print("KERNEL_OK")
</pallas_src>

<mosaic_0001>
module attributes {stable_mosaic.version = 11 : i64} {
  func.func @_copy_kernel(%arg0: i32, %arg1: memref<1x2048xf32, #tpu.memory_space<vmem>>, %arg2: memref<1x2048xf32, #tpu.memory_space<vmem>>) attributes {dimension_semantics = [#tpu.dimension_semantics<parallel>], iteration_bounds = array<i64: 1>, scalar_prefetch = 0 : i64, scratch_operands = 0 : i64, tpu.core_type = #tpu.core_type<tc>, window_params = [{transform_indices = @transform_0, window_bounds = array<i64: 1, 2048>}, {transform_indices = @transform_1, window_bounds = array<i64: 1, 2048>}]} {
    %c0 = arith.constant 0 : index
    %c0_0 = arith.constant 0 : index
    %0 = vector.load %arg1[%c0, %c0_0] : memref<1x2048xf32, #tpu.memory_space<vmem>>, vector<1x2048xf32>
    %c0_1 = arith.constant 0 : index
    %c0_2 = arith.constant 0 : index
    %1 = vector.load %arg2[%c0_1, %c0_2] : memref<1x2048xf32, #tpu.memory_space<vmem>>, vector<1x2048xf32>
    tpu.vector_store %arg2[%c0_1, %c0_2], %0 {strides = array<i32>} : memref<1x2048xf32, #tpu.memory_space<vmem>>, vector<1x2048xf32>,
    return
  }
  func.func @transform_0(%arg0: i32) -> (i32, i32) {
    %c0_i32 = arith.constant 0 : i32
    %c0_i32_0 = arith.constant 0 : i32
    return %arg0, %c0_i32 : i32, i32
  }
  func.func @transform_1(%arg0: i32) -> (i32, i32) {
    %c0_i32 = arith.constant 0 : i32
    %c0_i32_0 = arith.constant 0 : i32
    return %arg0, %c0_i32 : i32, i32
  }
}

</mosaic_0001>

<bundles_post_ra>
// kernel: tpu_custom_call.1
= control target key start
LH: loop header
LB: loop body
LE: loop exit
PB: predicated region body
PF: predicated region fallthrough
CT: control target
= control target key end

     0   :  { %6 = vsyncpa [#allocation3], 0  ;;  %s116_s0 = inlined_call_operand.hbm [shape: f32[1,2048], index: 0, kind: input, shape index: {}]   ;;  %s117_s1 = inlined_call_operand.hbm [shape: f32[1,2048], index: 1, kind: output, shape index: {}]  }
   0x1   :  { %7 = vsyncpa [#allocation4], 0  ;;  %s13_s8 = sshll.u32 %s116_s0, 4  ;;  %s98_s9 = smov [#allocation2]   ;;  %s14_s8 = int_to_ptr.hbm [resolvable:$true] %s13_s8 }
   0x2   :  { %s15_s10 = sshll.u32 %s98_s9, 4  ;;  %s16_s10 = int_to_ptr.vmem [resolvable:$true] %s15_s10 }
   0x3   :  { %18 = dma.hbm_to_vmem [thread:$0]  %s14_s8, 256, %s16_s10, [#allocation3]  }
   0x4   :  { %94 = dma.done.wait [#allocation3], 256  }
   0x5   :  { %95 = vsyncadd [#allocation3], 4294967040  ;;  %s99_s11 = smov [#allocation5]   ;;  %s34_s15 = sshll.u32 %s117_s1, 4  ;;  %v23_v0 = vld [vmem:[#allocation2] sm:$0xff]  ;;  %v24_v1 = vld [vmem:[#allocation2 + $0x8] sm:$0xff]  ;;  %s35_s15 = int_to_ptr.hbm [resolvable:$true] %s34_s15 }
   0x6   :  { %s32_s12 = sshll.u32 %s99_s11, 4  ;;  %25 = vst [vmem:[#allocation5] sm:$0xff] %v23_v0  ;;  %s33_s12 = int_to_ptr.vmem [resolvable:$true] %s32_s12 }
   0x7   :  { %26 = vst [vmem:[#allocation5 + $0x8] sm:$0xff] %v24_v1 }
   0x8   :  { %37 = dma.vmem_to_hbm [thread:$0]  %s33_s12, 256, %s35_s15, [#allocation4]  }
   0x9   :  { %96 = dma.done.wait [#allocation4], 256  }
   0xa   :  { %97 = vsyncadd [#allocation4], 4294967040 }
   0xb   :  { %42 = vsyncpa [#allocation3], 1 }
   0xc   :  { %43 = vsyncpa [#allocation4], 1 }

</bundles_post_ra>
